<compile_context>
chip_gen: v7x
topology: tpu7x:2x2x1
jax: 0.10.0
libtpu: 0.0.40
codegen_flags: <defaults>
</compile_context>

<pallas_src>
import functools

import jax
import jax.numpy as jnp
from jax.experimental import pallas as pl
from jax.experimental.pallas import tpu as pltpu

STATE_DIM = 9
ACTION_DIM = 1
HIDDEN_DIM = 128
MAX_ACTION = 250.0


def _round_up(x, m):
    return ((x + m - 1) // m) * m


def actor_kernel(x_ref, w1_ref, b1_ref, w2_ref, b2_ref, w3_ref, b3_ref,
                 o_ref, xp_ref, *, max_action):
    # ---- Stage the (TB, 9) state block into a zero-padded (TB, 128) slab ---
    # Rewritten every grid step (so the kernel stays correct when the
    # "parallel" batch axis is split across TensorCores); both writes are
    # store-slot work and hide under the MXU passes below.
    xp_ref[...] = jnp.zeros_like(xp_ref)
    xp_ref[:, :STATE_DIM] = x_ref[...]

    # ---- fc1 + ReLU: one aligned (TB,128)x(128,128) MXU pass ---------------
    # w1 arrives zero-padded to (128, 128); its padding rows only ever multiply
    # the zero lanes of xp, so the result is exactly x @ w1.
    h1 = jnp.dot(xp_ref[...], w1_ref[...], preferred_element_type=jnp.float32)
    h1 = jnp.maximum(h1 + b1_ref[...], 0.0)

    # ---- fc2 + ReLU on the MXU ----------------------------------------------
    h2 = jnp.dot(h1, w2_ref[...], preferred_element_type=jnp.float32)
    h2 = jnp.maximum(h2 + b2_ref[...], 0.0)

    # ---- fc3 (N=1): VPU multiply + XLU lane reduction ------------------------
    # An MXU matmul with N=1 wastes >99% of an output pass; mul -> VPU,
    # axis=-1 reduce -> XLU, both different VLIW slots from the MXU.
    h3 = jnp.sum(h2 * w3_ref[...], axis=-1, keepdims=True) + b3_ref[...]

    # Tanh (EUP) + scale.  (TB, 1) writeback is only 4 B/row, so the masked
    # store here is negligible.
    o_ref[...] = (max_action * jnp.tanh(h3)).astype(o_ref.dtype)


@functools.partial(jax.jit, static_argnames=("max_action", "block_b"))
def actor_forward(state, params, *, max_action=MAX_ACTION, block_b=2048):
    """state: [B, STATE_DIM] f32 -> returns [B, ACTION_DIM] f32."""
    w1, b1, w2, b2, w3, b3 = params
    B = state.shape[0]

    # fc1 weight zero-padded to a full (HIDDEN, HIDDEN) MXU tile.  64 KB
    # one-off on the weights (not the streamed batch); constant-folded /
    # hoisted when the weights are static under jit.
    w1p = jnp.zeros((HIDDEN_DIM, HIDDEN_DIM), w1.dtype).at[:STATE_DIM, :].set(w1)

    # Batch tile: multiple of 8 (sublane), capped at block_b.  Pad the batch
    # up to a multiple of the tile so every grid step sees a full block, then
    # slice the padding back off.
    tb = min(block_b, _round_up(B, 8))
    b_pad = _round_up(B, tb)
    if b_pad != B:
        state = jnp.pad(state, ((0, b_pad - B), (0, 0)))

    kernel = functools.partial(actor_kernel, max_action=max_action)
    resident = lambda shape: pl.BlockSpec(shape, lambda i: (0, 0))

    out = pl.pallas_call(
        kernel,
        out_shape=jax.ShapeDtypeStruct((b_pad, ACTION_DIM), jnp.float32),
        grid=(b_pad // tb,),
        in_specs=[
            pl.BlockSpec((tb, STATE_DIM), lambda i: (i, 0)),   # streamed rows
            resident(w1p.shape), resident(b1.shape),           # VMEM-resident
            resident(w2.shape), resident(b2.shape),
            resident(w3.shape), resident(b3.shape),
        ],
        out_specs=pl.BlockSpec((tb, ACTION_DIM), lambda i: (i, 0)),
        scratch_shapes=[pltpu.VMEM((tb, HIDDEN_DIM), jnp.float32)],
        compiler_params=pltpu.CompilerParams(
            dimension_semantics=("parallel",)),  # shard batch across TCs (v7x)
    )(state, w1p, b1, w2, b2, w3, b3)
    return out[:B]


def init_params(key):
    """torch.nn.Linear-style init (U(-1/sqrt(fan_in), 1/sqrt(fan_in))).

    w1, w2 stored [in_features, out_features]; w3 stored as a (1, HIDDEN_DIM)
    row (torch [out, in]); biases are 2D [1, out] so every operand is >= 2D.
    """
    k1w, k1b, k2w, k2b, k3w, k3b = jax.random.split(key, 6)

    def u(k, shape, fan_in):
        bound = fan_in ** -0.5
        return jax.random.uniform(k, shape, jnp.float32, -bound, bound)

    w1 = u(k1w, (STATE_DIM, HIDDEN_DIM), STATE_DIM)
    b1 = u(k1b, (1, HIDDEN_DIM), STATE_DIM)
    w2 = u(k2w, (HIDDEN_DIM, HIDDEN_DIM), HIDDEN_DIM)
    b2 = u(k2b, (1, HIDDEN_DIM), HIDDEN_DIM)
    w3 = u(k3w, (1, HIDDEN_DIM), HIDDEN_DIM)    # fc3 weight as a row vector
    b3 = u(k3b, (1, ACTION_DIM), HIDDEN_DIM)
    return (w1, b1, w2, b2, w3, b3)


def actor_reference(state, params, *, max_action=MAX_ACTION):
    w1, b1, w2, b2, w3, b3 = params
    h = jnp.maximum(state @ w1 + b1, 0.0)
    h = jnp.maximum(h @ w2 + b2, 0.0)
    return max_action * jnp.tanh(h @ w3.T + b3)


if __name__ == "__main__":
    key = jax.random.PRNGKey(0)
    k_params, k_state = jax.random.split(key)
    params = init_params(k_params)

    # Tolerances: both the kernel and the XLA reference route the 128-wide
    # matmuls through the MXU; remaining differences are rounding-order level,
    # scaled by max_action=250 through the (contracting) tanh.
    ATOL, RTOL = 2e-2, 2e-3

    # Small batch (matches the original toy usage); single grid step.
    state_small = jax.random.normal(k_state, (8, STATE_DIM), jnp.float32)
    out_small = jax.block_until_ready(actor_forward(state_small, params))
    ref_small = actor_reference(state_small, params)
    assert out_small.shape == (8, ACTION_DIM), out_small.shape
    assert jnp.allclose(out_small, ref_small, atol=ATOL, rtol=RTOL)

    # Larger, non-tile-multiple batch with a small block size: exercises the
    # multi-block batch grid, resident weights, megacore-parallel semantics,
    # the per-step scratch staging, and the padding/tail handling.
    k_state2 = jax.random.fold_in(k_state, 1)
    state_big = jax.random.normal(k_state2, (520, STATE_DIM), jnp.float32)
    out_big = jax.block_until_ready(
        actor_forward(state_big, params, block_b=256))
    ref_big = actor_reference(state_big, params)
    assert out_big.shape == (520, ACTION_DIM), out_big.shape
    assert jnp.allclose(out_big, ref_big, atol=ATOL, rtol=RTOL)

    print("KERNEL_OK")
</pallas_src>

<mosaic_0001>
module attributes {stable_mosaic.version = 11 : i64} {
  func.func @actor_kernel(%arg0: i32, %arg1: memref<8x9xf32, #tpu.memory_space<vmem>>, %arg2: memref<128x128xf32, #tpu.memory_space<vmem>>, %arg3: memref<1x128xf32, #tpu.memory_space<vmem>>, %arg4: memref<128x128xf32, #tpu.memory_space<vmem>>, %arg5: memref<1x128xf32, #tpu.memory_space<vmem>>, %arg6: memref<1x128xf32, #tpu.memory_space<vmem>>, %arg7: memref<1x1xf32, #tpu.memory_space<vmem>>, %arg8: memref<8x1xf32, #tpu.memory_space<vmem>>, %arg9: memref<8x128xf32, #tpu.memory_space<vmem>>) attributes {dimension_semantics = [#tpu.dimension_semantics<parallel>], iteration_bounds = array<i64: 1>, scalar_prefetch = 0 : i64, scratch_operands = 1 : i64, tpu.core_type = #tpu.core_type<tc>, window_params = [{transform_indices = @transform_0, window_bounds = array<i64: 8, 9>}, {pipeline_mode = #tpu.pipeline_mode<synchronous>, transform_indices = @transform_1, window_bounds = array<i64: 128, 128>}, {pipeline_mode = #tpu.pipeline_mode<synchronous>, transform_indices = @transform_2, window_bounds = array<i64: 1, 128>}, {pipeline_mode = #tpu.pipeline_mode<synchronous>, transform_indices = @transform_3, window_bounds = array<i64: 128, 128>}, {pipeline_mode = #tpu.pipeline_mode<synchronous>, transform_indices = @transform_4, window_bounds = array<i64: 1, 128>}, {pipeline_mode = #tpu.pipeline_mode<synchronous>, transform_indices = @transform_5, window_bounds = array<i64: 1, 128>}, {pipeline_mode = #tpu.pipeline_mode<synchronous>, transform_indices = @transform_6, window_bounds = array<i64: 1, 1>}, {transform_indices = @transform_7, window_bounds = array<i64: 8, 1>}]} {
    %cst = arith.constant 0.000000e+00 : f32
    %0 = vector.broadcast %cst : f32 to vector<8x128xf32>
    %c0 = arith.constant 0 : index
    %c0_0 = arith.constant 0 : index
    %1 = vector.load %arg9[%c0, %c0_0] : memref<8x128xf32, #tpu.memory_space<vmem>>, vector<8x128xf32>
    tpu.vector_store %arg9[%c0, %c0_0], %0 {strides = array<i32>} : memref<8x128xf32, #tpu.memory_space<vmem>>, vector<8x128xf32>,
    %c0_1 = arith.constant 0 : index
    %c0_2 = arith.constant 0 : index
    %2 = vector.load %arg1[%c0_1, %c0_2] : memref<8x9xf32, #tpu.memory_space<vmem>>, vector<8x9xf32>
    %c0_3 = arith.constant 0 : index
    %c0_4 = arith.constant 0 : index
    %3 = vector.load %arg9[%c0_3, %c0_4] : memref<8x128xf32, #tpu.memory_space<vmem>>, vector<8x9xf32>
    tpu.vector_store %arg9[%c0_3, %c0_4], %2 {strides = array<i32>} : memref<8x128xf32, #tpu.memory_space<vmem>>, vector<8x9xf32>,
    %c0_5 = arith.constant 0 : index
    %c0_6 = arith.constant 0 : index
    %4 = vector.load %arg9[%c0_5, %c0_6] : memref<8x128xf32, #tpu.memory_space<vmem>>, vector<8x128xf32>
    %c0_7 = arith.constant 0 : index
    %c0_8 = arith.constant 0 : index
    %5 = vector.load %arg2[%c0_7, %c0_8] : memref<128x128xf32, #tpu.memory_space<vmem>>, vector<128x128xf32>
    %cst_9 = arith.constant dense<0.000000e+00> : vector<8x128xf32>
    %6 = tpu.matmul %4, %5, %cst_9 {dimension_numbers = #tpu.dot_dimension_numbers<[1], [0], [0], [1], [0, 0, 1, 1], [], []>} : vector<8x128xf32>, vector<128x128xf32>, vector<8x128xf32> -> vector<8x128xf32>
    %c0_10 = arith.constant 0 : index
    %c0_11 = arith.constant 0 : index
    %7 = vector.load %arg3[%c0_10, %c0_11] : memref<1x128xf32, #tpu.memory_space<vmem>>, vector<1x128xf32>
    %8 = vector.broadcast %7 : vector<1x128xf32> to vector<8x128xf32>
    %9 = arith.addf %6, %8 : vector<8x128xf32>
    %cst_12 = arith.constant 0.000000e+00 : f32
    %10 = vector.broadcast %cst_12 : f32 to vector<8x128xf32>
    %11 = arith.maximumf %9, %10 : vector<8x128xf32>
    %c0_13 = arith.constant 0 : index
    %c0_14 = arith.constant 0 : index
    %12 = vector.load %arg4[%c0_13, %c0_14] : memref<128x128xf32, #tpu.memory_space<vmem>>, vector<128x128xf32>
    %cst_15 = arith.constant dense<0.000000e+00> : vector<8x128xf32>
    %13 = tpu.matmul %11, %12, %cst_15 {dimension_numbers = #tpu.dot_dimension_numbers<[1], [0], [0], [1], [0, 0, 1, 1], [], []>} : vector<8x128xf32>, vector<128x128xf32>, vector<8x128xf32> -> vector<8x128xf32>
    %c0_16 = arith.constant 0 : index
    %c0_17 = arith.constant 0 : index
    %14 = vector.load %arg5[%c0_16, %c0_17] : memref<1x128xf32, #tpu.memory_space<vmem>>, vector<1x128xf32>
    %15 = vector.broadcast %14 : vector<1x128xf32> to vector<8x128xf32>
    %16 = arith.addf %13, %15 : vector<8x128xf32>
    %cst_18 = arith.constant 0.000000e+00 : f32
    %17 = vector.broadcast %cst_18 : f32 to vector<8x128xf32>
    %18 = arith.maximumf %16, %17 : vector<8x128xf32>
    %c0_19 = arith.constant 0 : index
    %c0_20 = arith.constant 0 : index
    %19 = vector.load %arg6[%c0_19, %c0_20] : memref<1x128xf32, #tpu.memory_space<vmem>>, vector<1x128xf32>
    %20 = vector.broadcast %19 : vector<1x128xf32> to vector<8x128xf32>
    %21 = arith.mulf %18, %20 : vector<8x128xf32>
    %cst_21 = arith.constant dense<0.000000e+00> : vector<8xf32>
    %22 = vector.multi_reduction <add>, %21, %cst_21 [1] : vector<8x128xf32> to vector<8xf32>
    %23 = vector.shape_cast %22 : vector<8xf32> to vector<8x1xf32>
    %c0_22 = arith.constant 0 : index
    %c0_23 = arith.constant 0 : index
    %24 = vector.load %arg7[%c0_22, %c0_23] : memref<1x1xf32, #tpu.memory_space<vmem>>, vector<1x1xf32>
    %25 = vector.broadcast %24 : vector<1x1xf32> to vector<8x1xf32>
    %26 = arith.addf %23, %25 : vector<8x1xf32>
    %27 = math.tanh %26 : vector<8x1xf32>
    %cst_24 = arith.constant 2.500000e+02 : f32
    %28 = vector.broadcast %cst_24 : f32 to vector<8x1xf32>
    %29 = arith.mulf %28, %27 : vector<8x1xf32>
    %c0_25 = arith.constant 0 : index
    %c0_26 = arith.constant 0 : index
    %30 = vector.load %arg8[%c0_25, %c0_26] : memref<8x1xf32, #tpu.memory_space<vmem>>, vector<8x1xf32>
    tpu.vector_store %arg8[%c0_25, %c0_26], %29 {strides = array<i32>} : memref<8x1xf32, #tpu.memory_space<vmem>>, vector<8x1xf32>,
    return
  }
  func.func @transform_0(%arg0: i32) -> (i32, i32) {
    %c0_i32 = arith.constant 0 : i32
    %c0_i32_0 = arith.constant 0 : i32
    return %arg0, %c0_i32 : i32, i32
  }
  func.func @transform_1(%arg0: i32) -> (i32, i32) {
    %c0_i32 = arith.constant 0 : i32
    %c0_i32_0 = arith.constant 0 : i32
    %c0_i32_1 = arith.constant 0 : i32
    return %c0_i32, %c0_i32_0 : i32, i32
  }
  func.func @transform_2(%arg0: i32) -> (i32, i32) {
    %c0_i32 = arith.constant 0 : i32
    %c0_i32_0 = arith.constant 0 : i32
    %c0_i32_1 = arith.constant 0 : i32
    return %c0_i32, %c0_i32_0 : i32, i32
  }
  func.func @transform_3(%arg0: i32) -> (i32, i32) {
    %c0_i32 = arith.constant 0 : i32
    %c0_i32_0 = arith.constant 0 : i32
    %c0_i32_1 = arith.constant 0 : i32
    return %c0_i32, %c0_i32_0 : i32, i32
  }
  func.func @transform_4(%arg0: i32) -> (i32, i32) {
    %c0_i32 = arith.constant 0 : i32
    %c0_i32_0 = arith.constant 0 : i32
    %c0_i32_1 = arith.constant 0 : i32
    return %c0_i32, %c0_i32_0 : i32, i32
  }
  func.func @transform_5(%arg0: i32) -> (i32, i32) {
    %c0_i32 = arith.constant 0 : i32
    %c0_i32_0 = arith.constant 0 : i32
    %c0_i32_1 = arith.constant 0 : i32
    return %c0_i32, %c0_i32_0 : i32, i32
  }
  func.func @transform_6(%arg0: i32) -> (i32, i32) {
    %c0_i32 = arith.constant 0 : i32
    %c0_i32_0 = arith.constant 0 : i32
    %c0_i32_1 = arith.constant 0 : i32
    return %c0_i32, %c0_i32_0 : i32, i32
  }
  func.func @transform_7(%arg0: i32) -> (i32, i32) {
    %c0_i32 = arith.constant 0 : i32
    %c0_i32_0 = arith.constant 0 : i32
    return %arg0, %c0_i32 : i32, i32
  }
}

</mosaic_0001>

<bundles_post_ra>
// kernel: actor_forward.1
= control target key start
LH: loop header
LB: loop body
LE: loop exit
PB: predicated region body
PF: predicated region fallthrough
CT: control target
= control target key end

     0   :  { %v408_v0 = vmov 0.0|0.0   ;;  %v409_v4 = vmov 0.0   ;;  %vm410_vm0 = vmmov 0   ;;  %vm30_vm1 = vcmask 72704   ;;  %s581_s1 = inlined_call_operand.vmem [shape: f32[128,128], index: 1, kind: input, shape index: {}]   ;;  %s582_s0 = inlined_call_operand.vmem [shape: f32[8,9], index: 0, kind: input, shape index: {}]   ;;  %s583_s3 = inlined_call_operand.vmem [shape: f32[128,128], index: 3, kind: input, shape index: {}]   ;;  %s584_s2 = inlined_call_operand.vmem [shape: f32[1,128], index: 2, kind: input, shape index: {}]   ;;  %s585_s6 = inlined_call_operand.<no memory space> [shape: f32[1,1], index: 6, kind: input, shape index: {}]   ;;  %s586_s4 = inlined_call_operand.vmem [shape: f32[1,128], index: 4, kind: input, shape index: {}]   ;;  %s587_s5 = inlined_call_operand.vmem [shape: f32[1,128], index: 5, kind: input, shape index: {}]   ;;  %s588_s7 = inlined_call_operand.vmem [shape: f32[8,1], index: 7, kind: output, shape index: {}]  }
   0x1   :  { %355 = vmatprep.subr.bf16.mxu0 %v408_v0  ;;  %v33_v1 = vld [vmem:[%s581_s1] sm:$0xff]  ;;  %v34_v2 = vld [vmem:[%s581_s1 + $0x8] sm:$0xff]  ;;  %v35_v3 = vld [vmem:[%s581_s1 + $0x10] sm:$0xff]  ;;  %28 = vst [vmem:[#allocation2] sm:$0xff] %v409_v4  ;;  %317 = vmatprep.mubr.msk.f32.mxu0 %vm410_vm0, %v409_v4  ;;  %v12_v57 = vstv %s585_s6  ;;  %vm241_vm2 = vcmask 7168  }
   0x2   :  { %v356_v5 = vpack.c.bf16 %v34_v2, %v33_v1  ;;  %v36_v6 = vld [vmem:[%s581_s1 + $0x18] sm:$0xff]  ;;  %379 = vmatprep.subr.bf16.mxu1 %v408_v0  ;;  %352 = vmatprep.mubr.msk.f32.mxu1 %vm410_vm0, %v409_v4  ;;  %v37_v8 = vld [vmem:[%s581_s1 + $0x20] sm:$0xff]  ;;  %v38_v9 = vld [vmem:[%s581_s1 + $0x28] sm:$0xff]  ;;  %13 = vst [vmem:[#allocation3] sm:$0x1] %v12_v57 }
   0x3   :  { %v359_v7 = vpack.c.bf16 %v36_v6, %v35_v3  ;;  %v29_v10 = vld [vmem:[%s582_s0] sm:$0xff]  ;;  %v128_v12 = vld [vmem:[%s583_s3 + $0x8] sm:$0xff]  ;;  %v129_v13 = vld [vmem:[%s583_s3 + $0x10] sm:$0xff]  ;;  %v362_v15 = vpack.c.bf16 %v38_v9, %v37_v8 }
   0x4   :  { %357 = vmatpush3.bf16.msra.mxu0 %v356_v5  ;;  %v127_v11 = vld [vmem:[%s583_s3] sm:$0xff]  ;;  %31 = vst.msk [vmem:[#allocation2] sm:$0xff] %vm30_vm1, %v29_v10  ;;  %v130_v14 = vld [vmem:[%s583_s3 + $0x18] sm:$0xff]  ;;  %v39_v17 = vld [vmem:[%s581_s1 + $0x30] sm:$0xff] }
   0x5   :  { %358 = vmatprep.subr.bf16.mxu0 %v408_v0  ;;  %v380_v16 = vpack.c.bf16 %v128_v12, %v127_v11  ;;  %v40_v18 = vld [vmem:[%s581_s1 + $0x38] sm:$0xff]  ;;  %v383_v19 = vpack.c.bf16 %v130_v14, %v129_v13  ;;  %v131_v20 = vld [vmem:[%s583_s3 + $0x20] sm:$0xff]  ;;  %v132_v21 = vld [vmem:[%s583_s3 + $0x28] sm:$0xff] }
   0x6   :  { %v365_v22 = vpack.c.bf16 %v40_v18, %v39_v17  ;;  %v41_v23 = vld [vmem:[%s581_s1 + $0x40] sm:$0xff]  ;;  %v42_v24 = vld [vmem:[%s581_s1 + $0x48] sm:$0xff]  ;;  %v386_v25 = vpack.c.bf16 %v132_v21, %v131_v20  ;;  %v133_v26 = vld [vmem:[%s583_s3 + $0x30] sm:$0xff] }
   0x7   :  { %381 = vmatpush3.bf16.msra.mxu1 %v380_v16  ;;  %v134_v27 = vld [vmem:[%s583_s3 + $0x38] sm:$0xff]  ;;  %v368_v28 = vpack.c.bf16 %v42_v24, %v41_v23  ;;  %v43_v29 = vld [vmem:[%s581_s1 + $0x50] sm:$0xff]  ;;  %v135_v32 = vld [vmem:[%s583_s3 + $0x40] sm:$0xff] }
   0x8   :  { %360 = vmatpush3.bf16.msra.mxu0 %v359_v7  ;;  %382 = vmatprep.subr.bf16.mxu1 %v408_v0  ;;  %v44_v30 = vld [vmem:[%s581_s1 + $0x58] sm:$0xff]  ;;  %v389_v31 = vpack.c.bf16 %v134_v27, %v133_v26  ;;  %v136_v33 = vld [vmem:[%s583_s3 + $0x48] sm:$0xff]  ;;  %v45_v35 = vld [vmem:[%s581_s1 + $0x60] sm:$0xff] }
   0x9   :  { %361 = vmatprep.subr.bf16.mxu0 %v408_v0  ;;  %v371_v34 = vpack.c.bf16 %v44_v30, %v43_v29  ;;  %v46_v36 = vld [vmem:[%s581_s1 + $0x68] sm:$0xff]  ;;  %v392_v37 = vpack.c.bf16 %v136_v33, %v135_v32  ;;  %v137_v38 = vld [vmem:[%s583_s3 + $0x50] sm:$0xff]  ;;  %v138_v39 = vld [vmem:[%s583_s3 + $0x58] sm:$0xff] }
   0xa   :  { %v374_v40 = vpack.c.bf16 %v46_v36, %v45_v35  ;;  %v47_v41 = vld [vmem:[%s581_s1 + $0x70] sm:$0xff]  ;;  %v48_v42 = vld [vmem:[%s581_s1 + $0x78] sm:$0xff]  ;;  %v395_v43 = vpack.c.bf16 %v138_v39, %v137_v38  ;;  %v139_v44 = vld [vmem:[%s583_s3 + $0x60] sm:$0xff] }
   0xb   :  { %384 = vmatpush3.bf16.msra.mxu1 %v383_v19  ;;  %v140_v45 = vld [vmem:[%s583_s3 + $0x68] sm:$0xff]  ;;  %v377_v46 = vpack.c.bf16 %v48_v42, %v47_v41  ;;  %v32_v48 = vld [vmem:[#allocation2] sm:$0xff]  ;;  %v141_v49 = vld [vmem:[%s583_s3 + $0x70] sm:$0xff] }
   0xc   :  { %363 = vmatpush3.bf16.msra.mxu0 %v362_v15  ;;  %385 = vmatprep.subr.bf16.mxu1 %v408_v0  ;;  %v398_v47 = vpack.c.bf16 %v140_v45, %v139_v44  ;;  %v142_v50 = vld [vmem:[%s583_s3 + $0x78] sm:$0xff]  ;;  %v247_v52 = vld [vmem:[%s584_s2] ss:$0 sm:$0xff]  ;;  %v250_v1 = vld [vmem:[#allocation3] ss:$0 sm:$0xff] }
   0xd   :  { %364 = vmatprep.subr.bf16.mxu0 %v408_v0  ;;  %v401_v51 = vpack.c.bf16 %v142_v50, %v141_v49  ;;  %v248_v58 = vld [vmem:[%s586_s4] ss:$0 sm:$0xff] }
   0xe   :  { %v249_v62 = vld [vmem:[%s587_s5] ss:$0 sm:$0xff] }
   0xf   :  { %387 = vmatpush3.bf16.msra.mxu1 %v386_v25 }
  0x10   :  { %366 = vmatpush3.bf16.msra.mxu0 %v365_v22  ;;  %388 = vmatprep.subr.bf16.mxu1 %v408_v0 }
  0x11   :  { %367 = vmatprep.subr.bf16.mxu0 %v408_v0 }
  0x13   :  { %390 = vmatpush3.bf16.msra.mxu1 %v389_v31 }
  0x14   :  { %369 = vmatpush3.bf16.msra.mxu0 %v368_v28  ;;  %391 = vmatprep.subr.bf16.mxu1 %v408_v0 }
  0x15   :  { %370 = vmatprep.subr.bf16.mxu0 %v408_v0 }
  0x17   :  { %393 = vmatpush3.bf16.msra.mxu1 %v392_v37 }
  0x18   :  { %372 = vmatpush3.bf16.msra.mxu0 %v371_v34  ;;  %394 = vmatprep.subr.bf16.mxu1 %v408_v0 }
  0x19   :  { %373 = vmatprep.subr.bf16.mxu0 %v408_v0 }
  0x1b   :  { %396 = vmatpush3.bf16.msra.mxu1 %v395_v43 }
  0x1c   :  { %375 = vmatpush3.bf16.msra.mxu0 %v374_v40  ;;  %397 = vmatprep.subr.bf16.mxu1 %v408_v0 }
  0x1d   :  { %376 = vmatprep.subr.bf16.mxu0 %v408_v0 }
  0x1f   :  { %399 = vmatpush3.bf16.msra.mxu1 %v398_v47 }
  0x20   :  { %378 = vmatpush3.bf16.msra.mxu0 %v377_v46  ;;  %400 = vmatprep.subr.bf16.mxu1 %v408_v0 }
  0x23   :  { %318 = vmatmul.mubr.f32.vlgmr.msra.gmra.mrb[0].mxu0 %v32_v48  ;;  %402 = vmatpush3.bf16.msra.mxu1 %v401_v51 }
  0xf6   :  { %v122_v53 = vpop.f32.mrb[0].mxu0 }
  0xf7   :  { %v123_v54 = vadd.f32 %v247_v52, %v122_v53  ;;  %v319_v55 = vpop.f32.mrb[1].mxu0 }
  0xf9   :  { %v126_v56 = vmax.f32 %v123_v54, 0.0 }
  0xfb   :  { %353 = vmatmul.mubr.f32.vlgmr.msra.gmra.mrb[0].mxu1 %v126_v56 }
 0x1ce   :  { %v216_v59 = vpop.f32.mrb[0].mxu1 }
 0x1cf   :  { %v217_v60 = vadd.f32 %v248_v58, %v216_v59  ;;  %v354_v61 = vpop.f32.mrb[1].mxu1 }
 0x1d1   :  { %v220_v63 = vmax.f32 %v217_v60, 0.0 }
 0x1d3   :  { %v228_v0 = vmul.f32 %v249_v62, %v220_v63 }
 0x1d5   :  { %229 = vadd.xlane.f32.xlu0 %v228_v0 }
 0x262   :  { %v230_v2 = vpop.xlane.xlu0 %229 }
 0x263   :  { %v238_v3 = vadd.f32 %v250_v1, %v230_v2 }
 0x265   :  { %406 = vtanh.f32 %v238_v3 }
 0x26f   :  { %v407_v4 = vpop.eup %406 }
 0x270   :  { %v240_v5 = vmul.f32 250.0, %v407_v4 }
 0x272   :  { %242 = vst.msk [vmem:[%s588_s7] sm:$0xff] %vm241_vm2, %v240_v5 }

</bundles_post_ra>
